<compile_context>
chip_gen: v5e
topology: v5e:2x2
jax: 0.10.0
libtpu: 0.0.40
codegen_flags: <defaults>
</compile_context>

<pallas_src>
import math
from functools import partial

import jax
import jax.numpy as jnp
from jax.experimental import pallas as pl
from jax.experimental.pallas import tpu as pltpu


def sru_kernel(x_ref, p_ref, o_ref, *, n_per_group, g_half, eps, thresh):
    x = x_ref[...]                        # (bn, G, L) native dtype
    w = p_ref[0]                          # (G, L) f32, per-channel weight
    b = p_ref[1]                          # (G, L) f32, per-channel bias
    wg = p_ref[2]                         # (G, L) f32, per-channel w_gamma

    inv_n = 1.0 / n_per_group
    inv_nm1 = 1.0 / max(n_per_group - 1, 1)   # unbiased std (torch.std default)

    top = slice(0, g_half)
    bot = slice(g_half, 2 * g_half)

    def gated(sl):
        xh = x[:, sl].astype(jnp.float32)                          # (bn, gh, L)
        mean = jnp.sum(xh, axis=2, keepdims=True) * inv_n          # (bn, gh, 1)
        xc = xh - mean
        var = jnp.sum(xc * xc, axis=2, keepdims=True) * inv_nm1    # (bn, gh, 1)
        inv_std = 1.0 / (jnp.sqrt(var) + eps)
        gn = (xc * inv_std) * w[sl] + b[sl]                        # (bn, gh, L)
        # sigmoid(gn * w_gamma) >= gate  <=>  gn * w_gamma >= logit(gate)
        keep = (gn * wg[sl]) >= thresh
        return gn, keep

    gn_t, k_t = gated(top)
    gn_b, k_b = gated(bot)

    # reconstruct(): cross-add informative / non-informative halves.
    o_ref[:, top, :] = (jnp.where(k_t, gn_t, 0.0)
                        + jnp.where(k_b, 0.0, gn_b)).astype(o_ref.dtype)
    o_ref[:, bot, :] = (jnp.where(k_b, gn_b, 0.0)
                        + jnp.where(k_t, 0.0, gn_t)).astype(o_ref.dtype)


def sru_forward(x, weight, bias, *, group_num=16, gate_treshold=0.5, eps=1e-10,
                block_batch=None):
    N, C, H, W = x.shape
    assert C >= group_num and C % group_num == 0
    assert group_num % 2 == 0, "half-channel split must align with group blocks"
    assert 0.0 < gate_treshold < 1.0
    G = group_num
    cpg = C // G
    HW = H * W
    L = cpg * HW

    # Native dtype in/out; f32 math happens inside the kernel.
    xf = x.reshape(N, G, L)

    # Per-channel params, pre-broadcast across their HW lanes on the host so
    # the kernel stays pure per-vreg VPU math.
    w = weight.reshape(G, cpg, 1).astype(jnp.float32)
    b = bias.reshape(G, cpg, 1).astype(jnp.float32)
    wg = (weight / jnp.sum(weight)).reshape(G, cpg, 1).astype(jnp.float32)
    params = jnp.broadcast_to(jnp.stack([w, b, wg], axis=0),
                              (3, G, cpg, HW)).reshape(3, G, L)

    # Move the sigmoid threshold into pre-activation space (exact, monotone).
    thresh = float(math.log(gate_treshold / (1.0 - gate_treshold)))

    # ---------------- generation-aware block sizing ----------------
    cdiv = lambda a, d: -(-a // d)
    try:
        info = pltpu.get_tpu_info()
        vmem_cap = int(getattr(info, "vmem_capacity_bytes", 0) or (128 << 20))
    except Exception:  # pragma: no cover - be robust off-TPU / old jax
        vmem_cap = 128 << 20
    # v7x exposes ~64 MiB of VMEM per TensorCore and has 2 TCs per chip;
    # v5e/v6e have 128 MiB and a single TC.
    multi_tc = vmem_cap <= (64 << 20)

    pad_sub = cdiv(G, 8) * 8
    pad_lane = cdiv(L, 128) * 128
    elem_f32 = pad_sub * pad_lane * 4          # one batch element, f32, padded
    param_bytes = 3 * pad_sub * pad_lane * 4

    # Per-step VMEM estimate: double-buffered in + out plus in-kernel
    # temporaries (upcast copy, gn halves, masks) ~ 8x block (f32 sizing,
    # conservative) + params (kept resident, count 2x) + headroom.
    scoped_cap = max(vmem_cap - (12 << 20), 32 << 20)
    block_cap = (6 << 20) if multi_tc else (12 << 20)
    bn_cap = max(1, block_cap // elem_f32)
    bn_fit = max(1, (scoped_cap - 2 * param_bytes - (8 << 20)) // (8 * elem_f32))

    if block_batch is None:
        bn = max(1, min(N, bn_cap, bn_fit))
        if multi_tc and N > 1:
            bn = min(bn, cdiv(N, 2))            # >= 2 grid steps for 2 TCs
            steps = cdiv(N, bn)
            if steps > 1 and steps % 2 == 1:    # balanced megacore sharding
                bn = max(1, cdiv(N, steps + 1))
    else:
        bn = max(1, min(N, int(block_batch)))

    # TODO(synk): add an HW-tiled two-pass (accumulate-then-normalize) grid
    # axis for layers where a single batch element plus params no longer fits
    # the scoped-VMEM budget (e.g. C=256 at 112x112 on v7x).

    need = 8 * bn * elem_f32 + 2 * param_bytes + (8 << 20)
    vmem_limit = int(max(32 << 20, min(need, scoped_cap)))

    kernel = partial(sru_kernel, n_per_group=L, g_half=G // 2,
                     eps=eps, thresh=thresh)

    out = pl.pallas_call(
        kernel,
        out_shape=jax.ShapeDtypeStruct((N, G, L), x.dtype),
        grid_spec=pltpu.PrefetchScalarGridSpec(
            num_scalar_prefetch=0,
            grid=(cdiv(N, bn),),
            in_specs=[
                pl.BlockSpec((bn, G, L), lambda i: (i, 0, 0)),   # x
                pl.BlockSpec((3, G, L), lambda i: (0, 0, 0)),    # w / b / w_gamma
            ],
            out_specs=pl.BlockSpec((bn, G, L), lambda i: (i, 0, 0)),
        ),
        compiler_params=pltpu.CompilerParams(
            dimension_semantics=("parallel",),
            vmem_limit_bytes=vmem_limit),
    )(xf, params)

    return out.reshape(N, C, H, W)


def sru_reference(x, weight, bias, *, group_num=16, gate_treshold=0.5, eps=1e-10):
    """Pure-JAX reference matching the PyTorch forward exactly (f32)."""
    N, C, H, W = x.shape
    x = x.astype(jnp.float32)
    xg = x.reshape(N, group_num, -1)
    n = xg.shape[2]
    mean = xg.mean(axis=2, keepdims=True)
    var = ((xg - mean) ** 2).sum(axis=2, keepdims=True) / (n - 1)   # unbiased std
    std = jnp.sqrt(var)
    xn = ((xg - mean) / (std + eps)).reshape(N, C, H, W)
    weight = weight.astype(jnp.float32)
    gn_x = xn * weight.reshape(1, C, 1, 1) + bias.astype(jnp.float32).reshape(1, C, 1, 1)
    w_gamma = (weight / jnp.sum(weight)).reshape(1, C, 1, 1)
    rew = jax.nn.sigmoid(gn_x * w_gamma)
    info = rew >= gate_treshold
    x1 = jnp.where(info, gn_x, 0.0)
    x2 = jnp.where(~info, gn_x, 0.0)
    half = C // 2
    return jnp.concatenate(
        [x1[:, :half] + x2[:, half:], x1[:, half:] + x2[:, :half]], axis=1)


if __name__ == "__main__":
    key = jax.random.PRNGKey(0)
    k_x, k_w, k_x2 = jax.random.split(key, 3)

    # ---- primary check: f32, default config ----
    N, C, H, W = 2, 32, 16, 16
    group_num = 16

    x = jax.random.normal(k_x, (N, C, H, W), dtype=jnp.float32)
    # GroupBatchnorm2d.__init__: weight ~ randn(C,1,1), bias = zeros(C,1,1)
    weight = jax.random.normal(k_w, (C,), dtype=jnp.float32)
    bias = jnp.zeros((C,), dtype=jnp.float32)

    out = jax.block_until_ready(sru_forward(x, weight, bias, group_num=group_num))
    ref = sru_reference(x, weight, bias, group_num=group_num)
    assert out.shape == (N, C, H, W)
    assert jnp.allclose(out, ref, atol=1e-4, rtol=1e-4), "f32 mismatch vs reference"

    # ---- secondary check: bf16 input, ragged batch tiling (cdiv grid) ----
    Nb, Hb, Wb = 3, 12, 12
    xb = jax.random.normal(k_x2, (Nb, C, Hb, Wb), dtype=jnp.float32).astype(jnp.bfloat16)
    out_b = jax.block_until_ready(
        sru_forward(xb, weight, bias, group_num=group_num, block_batch=2))
    ref_b = sru_reference(xb.astype(jnp.float32), weight, bias, group_num=group_num)
    assert out_b.shape == (Nb, C, Hb, Wb) and out_b.dtype == jnp.bfloat16
    close = jnp.isclose(out_b.astype(jnp.float32), ref_b, atol=2e-2, rtol=2e-2)
    # allow for (vanishingly rare) gate-threshold tie flips vs the sigmoid form
    assert float(jnp.mean(close)) > 0.999, "bf16/ragged mismatch vs reference"

    print("KERNEL_OK")
</pallas_src>

<mosaic_0001>
module attributes {stable_mosaic.version = 11 : i64} {
  func.func @sru_kernel(%arg0: i32, %arg1: memref<2x16x512xf32, #tpu.memory_space<vmem>>, %arg2: memref<3x16x512xf32, #tpu.memory_space<vmem>>, %arg3: memref<2x16x512xf32, #tpu.memory_space<vmem>>) attributes {dimension_semantics = [#tpu.dimension_semantics<parallel>], iteration_bounds = array<i64: 1>, scalar_prefetch = 0 : i64, scratch_operands = 0 : i64, tpu.core_type = #tpu.core_type<tc>, window_params = [{transform_indices = @transform_0, window_bounds = array<i64: 2, 16, 512>}, {pipeline_mode = #tpu.pipeline_mode<synchronous>, transform_indices = @transform_1, window_bounds = array<i64: 3, 16, 512>}, {transform_indices = @transform_2, window_bounds = array<i64: 2, 16, 512>}]} {
    %c0 = arith.constant 0 : index
    %c0_0 = arith.constant 0 : index
    %c0_1 = arith.constant 0 : index
    %0 = vector.load %arg1[%c0, %c0_0, %c0_1] : memref<2x16x512xf32, #tpu.memory_space<vmem>>, vector<2x16x512xf32>
    %c0_2 = arith.constant 0 : index
    %c0_3 = arith.constant 0 : index
    %c0_4 = arith.constant 0 : index
    %1 = vector.load %arg2[%c0_2, %c0_3, %c0_4] : memref<3x16x512xf32, #tpu.memory_space<vmem>>, vector<1x16x512xf32>
    %2 = vector.shape_cast %1 : vector<1x16x512xf32> to vector<16x512xf32>
    %c1 = arith.constant 1 : index
    %c0_5 = arith.constant 0 : index
    %c0_6 = arith.constant 0 : index
    %3 = vector.load %arg2[%c1, %c0_5, %c0_6] : memref<3x16x512xf32, #tpu.memory_space<vmem>>, vector<1x16x512xf32>
    %4 = vector.shape_cast %3 : vector<1x16x512xf32> to vector<16x512xf32>
    %c2 = arith.constant 2 : index
    %c0_7 = arith.constant 0 : index
    %c0_8 = arith.constant 0 : index
    %5 = vector.load %arg2[%c2, %c0_7, %c0_8] : memref<3x16x512xf32, #tpu.memory_space<vmem>>, vector<1x16x512xf32>
    %6 = vector.shape_cast %5 : vector<1x16x512xf32> to vector<16x512xf32>
    %7 = vector.extract_strided_slice %0 {offsets = [0, 0, 0], sizes = [2, 8, 512], strides = [1, 1, 1]} : vector<2x16x512xf32> to vector<2x8x512xf32>
    %cst = arith.constant dense<0.000000e+00> : vector<2x8xf32>
    %8 = vector.multi_reduction <add>, %7, %cst [2] : vector<2x8x512xf32> to vector<2x8xf32>
    %9 = vector.shape_cast %8 : vector<2x8xf32> to vector<2x8x1xf32>
    %cst_9 = arith.constant 0.001953125 : f32
    %10 = vector.broadcast %cst_9 : f32 to vector<2x8x1xf32>
    %11 = arith.mulf %9, %10 : vector<2x8x1xf32>
    %12 = vector.broadcast %11 : vector<2x8x1xf32> to vector<2x8x512xf32>
    %13 = arith.subf %7, %12 : vector<2x8x512xf32>
    %14 = arith.mulf %13, %13 : vector<2x8x512xf32>
    %cst_10 = arith.constant dense<0.000000e+00> : vector<2x8xf32>
    %15 = vector.multi_reduction <add>, %14, %cst_10 [2] : vector<2x8x512xf32> to vector<2x8xf32>
    %16 = vector.shape_cast %15 : vector<2x8xf32> to vector<2x8x1xf32>
    %cst_11 = arith.constant 0.00195694715 : f32
    %17 = vector.broadcast %cst_11 : f32 to vector<2x8x1xf32>
    %18 = arith.mulf %16, %17 : vector<2x8x1xf32>
    %19 = math.sqrt %18 : vector<2x8x1xf32>
    %cst_12 = arith.constant 1.000000e-10 : f32
    %20 = vector.broadcast %cst_12 : f32 to vector<2x8x1xf32>
    %21 = arith.addf %19, %20 : vector<2x8x1xf32>
    %cst_13 = arith.constant 1.000000e+00 : f32
    %22 = vector.broadcast %cst_13 : f32 to vector<2x8x1xf32>
    %23 = arith.divf %22, %21 : vector<2x8x1xf32>
    %24 = vector.broadcast %23 : vector<2x8x1xf32> to vector<2x8x512xf32>
    %25 = arith.mulf %13, %24 : vector<2x8x512xf32>
    %26 = vector.extract_strided_slice %2 {offsets = [0, 0], sizes = [8, 512], strides = [1, 1]} : vector<16x512xf32> to vector<8x512xf32>
    %27 = vector.shape_cast %26 : vector<8x512xf32> to vector<1x8x512xf32>
    %28 = vector.broadcast %27 : vector<1x8x512xf32> to vector<2x8x512xf32>
    %29 = arith.mulf %25, %28 : vector<2x8x512xf32>
    %30 = vector.extract_strided_slice %4 {offsets = [0, 0], sizes = [8, 512], strides = [1, 1]} : vector<16x512xf32> to vector<8x512xf32>
    %31 = vector.shape_cast %30 : vector<8x512xf32> to vector<1x8x512xf32>
    %32 = vector.broadcast %31 : vector<1x8x512xf32> to vector<2x8x512xf32>
    %33 = arith.addf %29, %32 : vector<2x8x512xf32>
    %34 = vector.extract_strided_slice %6 {offsets = [0, 0], sizes = [8, 512], strides = [1, 1]} : vector<16x512xf32> to vector<8x512xf32>
    %35 = vector.shape_cast %34 : vector<8x512xf32> to vector<1x8x512xf32>
    %36 = vector.broadcast %35 : vector<1x8x512xf32> to vector<2x8x512xf32>
    %37 = arith.mulf %33, %36 : vector<2x8x512xf32>
    %cst_14 = arith.constant 0.000000e+00 : f32
    %38 = vector.broadcast %cst_14 : f32 to vector<2x8x512xf32>
    %39 = arith.cmpf oge, %37, %38 : vector<2x8x512xf32>
    %40 = vector.extract_strided_slice %0 {offsets = [0, 8, 0], sizes = [2, 8, 512], strides = [1, 1, 1]} : vector<2x16x512xf32> to vector<2x8x512xf32>
    %cst_15 = arith.constant dense<0.000000e+00> : vector<2x8xf32>
    %41 = vector.multi_reduction <add>, %40, %cst_15 [2] : vector<2x8x512xf32> to vector<2x8xf32>
    %42 = vector.shape_cast %41 : vector<2x8xf32> to vector<2x8x1xf32>
    %cst_16 = arith.constant 0.001953125 : f32
    %43 = vector.broadcast %cst_16 : f32 to vector<2x8x1xf32>
    %44 = arith.mulf %42, %43 : vector<2x8x1xf32>
    %45 = vector.broadcast %44 : vector<2x8x1xf32> to vector<2x8x512xf32>
    %46 = arith.subf %40, %45 : vector<2x8x512xf32>
    %47 = arith.mulf %46, %46 : vector<2x8x512xf32>
    %cst_17 = arith.constant dense<0.000000e+00> : vector<2x8xf32>
    %48 = vector.multi_reduction <add>, %47, %cst_17 [2] : vector<2x8x512xf32> to vector<2x8xf32>
    %49 = vector.shape_cast %48 : vector<2x8xf32> to vector<2x8x1xf32>
    %cst_18 = arith.constant 0.00195694715 : f32
    %50 = vector.broadcast %cst_18 : f32 to vector<2x8x1xf32>
    %51 = arith.mulf %49, %50 : vector<2x8x1xf32>
    %52 = math.sqrt %51 : vector<2x8x1xf32>
    %cst_19 = arith.constant 1.000000e-10 : f32
    %53 = vector.broadcast %cst_19 : f32 to vector<2x8x1xf32>
    %54 = arith.addf %52, %53 : vector<2x8x1xf32>
    %cst_20 = arith.constant 1.000000e+00 : f32
    %55 = vector.broadcast %cst_20 : f32 to vector<2x8x1xf32>
    %56 = arith.divf %55, %54 : vector<2x8x1xf32>
    %57 = vector.broadcast %56 : vector<2x8x1xf32> to vector<2x8x512xf32>
    %58 = arith.mulf %46, %57 : vector<2x8x512xf32>
    %59 = vector.extract_strided_slice %2 {offsets = [8, 0], sizes = [8, 512], strides = [1, 1]} : vector<16x512xf32> to vector<8x512xf32>
    %60 = vector.shape_cast %59 : vector<8x512xf32> to vector<1x8x512xf32>
    %61 = vector.broadcast %60 : vector<1x8x512xf32> to vector<2x8x512xf32>
    %62 = arith.mulf %58, %61 : vector<2x8x512xf32>
    %63 = vector.extract_strided_slice %4 {offsets = [8, 0], sizes = [8, 512], strides = [1, 1]} : vector<16x512xf32> to vector<8x512xf32>
    %64 = vector.shape_cast %63 : vector<8x512xf32> to vector<1x8x512xf32>
    %65 = vector.broadcast %64 : vector<1x8x512xf32> to vector<2x8x512xf32>
    %66 = arith.addf %62, %65 : vector<2x8x512xf32>
    %67 = vector.extract_strided_slice %6 {offsets = [8, 0], sizes = [8, 512], strides = [1, 1]} : vector<16x512xf32> to vector<8x512xf32>
    %68 = vector.shape_cast %67 : vector<8x512xf32> to vector<1x8x512xf32>
    %69 = vector.broadcast %68 : vector<1x8x512xf32> to vector<2x8x512xf32>
    %70 = arith.mulf %66, %69 : vector<2x8x512xf32>
    %cst_21 = arith.constant 0.000000e+00 : f32
    %71 = vector.broadcast %cst_21 : f32 to vector<2x8x512xf32>
    %72 = arith.cmpf oge, %70, %71 : vector<2x8x512xf32>
    %cst_22 = arith.constant 0.000000e+00 : f32
    %73 = vector.broadcast %cst_22 : f32 to vector<2x8x512xf32>
    %74 = arith.select %39, %33, %73 : vector<2x8x512xi1>, vector<2x8x512xf32>
    %cst_23 = arith.constant 0.000000e+00 : f32
    %75 = vector.broadcast %cst_23 : f32 to vector<2x8x512xf32>
    %76 = arith.select %72, %75, %66 : vector<2x8x512xi1>, vector<2x8x512xf32>
    %77 = arith.addf %74, %76 : vector<2x8x512xf32>
    %c0_24 = arith.constant 0 : index
    %c0_25 = arith.constant 0 : index
    %c0_26 = arith.constant 0 : index
    %78 = vector.load %arg3[%c0_24, %c0_25, %c0_26] : memref<2x16x512xf32, #tpu.memory_space<vmem>>, vector<2x8x512xf32>
    tpu.vector_store %arg3[%c0_24, %c0_25, %c0_26], %77 {strides = array<i32>} : memref<2x16x512xf32, #tpu.memory_space<vmem>>, vector<2x8x512xf32>,
    %cst_27 = arith.constant 0.000000e+00 : f32
    %79 = vector.broadcast %cst_27 : f32 to vector<2x8x512xf32>
    %80 = arith.select %72, %66, %79 : vector<2x8x512xi1>, vector<2x8x512xf32>
    %cst_28 = arith.constant 0.000000e+00 : f32
    %81 = vector.broadcast %cst_28 : f32 to vector<2x8x512xf32>
    %82 = arith.select %39, %81, %33 : vector<2x8x512xi1>, vector<2x8x512xf32>
    %83 = arith.addf %80, %82 : vector<2x8x512xf32>
    %c0_29 = arith.constant 0 : index
    %c8 = arith.constant 8 : index
    %c0_30 = arith.constant 0 : index
    %84 = vector.load %arg3[%c0_29, %c8, %c0_30] : memref<2x16x512xf32, #tpu.memory_space<vmem>>, vector<2x8x512xf32>
    tpu.vector_store %arg3[%c0_29, %c8, %c0_30], %83 {strides = array<i32>} : memref<2x16x512xf32, #tpu.memory_space<vmem>>, vector<2x8x512xf32>,
    return
  }
  func.func @transform_0(%arg0: i32) -> (i32, i32, i32) {
    %c0_i32 = arith.constant 0 : i32
    %c0_i32_0 = arith.constant 0 : i32
    %c0_i32_1 = arith.constant 0 : i32
    return %arg0, %c0_i32, %c0_i32_0 : i32, i32, i32
  }
  func.func @transform_1(%arg0: i32) -> (i32, i32, i32) {
    %c0_i32 = arith.constant 0 : i32
    %c0_i32_0 = arith.constant 0 : i32
    %c0_i32_1 = arith.constant 0 : i32
    %c0_i32_2 = arith.constant 0 : i32
    return %c0_i32, %c0_i32_0, %c0_i32_1 : i32, i32, i32
  }
  func.func @transform_2(%arg0: i32) -> (i32, i32, i32) {
    %c0_i32 = arith.constant 0 : i32
    %c0_i32_0 = arith.constant 0 : i32
    %c0_i32_1 = arith.constant 0 : i32
    return %arg0, %c0_i32, %c0_i32_0 : i32, i32, i32
  }
}

</mosaic_0001>

<bundles_post_ra>
// kernel: tpu_custom_call.1
= control target key start
LH: loop header
LB: loop body
LE: loop exit
PB: predicated region body
PF: predicated region fallthrough
CT: control target
= control target key end

     0   :  { %7 = vsyncpa [#allocation3], 0  ;;  %s807_s0 = inlined_call_operand.hbm [shape: f32[2,16,512], index: 0, kind: input, shape index: {}]   ;;  %s808_s1 = inlined_call_operand.hbm [shape: f32[3,16,512], index: 1, kind: input, shape index: {}]   ;;  %s809_s2 = inlined_call_operand.hbm [shape: f32[2,16,512], index: 2, kind: output, shape index: {}]  }
   0x1   :  { %8 = vsyncpa [#allocation6], 0 }
   0x2   :  { %9 = vsyncpa [#allocation4], 0  ;;  %s14_s11 = sshll.u32 %s807_s0, 4  ;;  %s541_s12 = smov [#allocation2]   ;;  %s15_s11 = int_to_ptr.hbm [resolvable:$true] %s14_s11 }
   0x3   :  { %s16_s13 = sshll.u32 %s541_s12, 4  ;;  %s27_s16 = sshll.u32 %s808_s1, 4  ;;  %s17_s13 = int_to_ptr.vmem [resolvable:$true] %s16_s13  ;;  %s28_s16 = int_to_ptr.hbm [resolvable:$true] %s27_s16 }
   0x4   :  { %s542_s17 = smov 512   ;;  %s543_s18 = smov 32  }
   0x5   :  { %22 = dma.hbm_to_vmem [thread:$0]  %s15_s11, 2048, %s17_s13, [#allocation3], %s542_s17, %s542_s17, %s543_s18  }
   0x6   :  { %s544_s19 = smov [#allocation5]  }
   0x7   :  { %s29_s20 = sshll.u32 %s544_s19, 4  ;;  %s30_s20 = int_to_ptr.vmem [resolvable:$true] %s29_s20 }
   0x8   :  { %35 = dma.hbm_to_vmem [thread:$0]  %s28_s16, 3072, %s30_s20, [#allocation6], %s542_s17, %s542_s17, %s543_s18  }
   0x9   :  { %535 = dma.done.wait [#allocation3], 2048  }
   0xa   :  { %536 = vsyncadd [#allocation3], 4294965248 }
   0xb   :  { %537 = dma.done.wait [#allocation6], 3072  }
   0xc   :  { %538 = vsyncadd [#allocation6], 4294964224  ;;  %v48_v0 = vld [vmem:[#allocation2 + $0x20] sm:$0xff]  ;;  %v49_v1 = vld [vmem:[#allocation2 + $0x28] sm:$0xff]  ;;  %s545_s0 = smov [#allocation7]   ;;  %s428_s23 = sshll.u32 %s809_s2, 4  ;;  %s429_s23 = int_to_ptr.hbm [resolvable:$true] %s428_s23 }
   0xd   :  { %v50_v2 = vld [vmem:[#allocation2 + $0x30] sm:$0xff]  ;;  %v222_v3 = vadd.f32 %v49_v1, %v48_v0  ;;  %v44_v4 = vld [vmem:[#allocation2] sm:$0xff]  ;;  %v45_v5 = vld [vmem:[#allocation2 + $0x8] sm:$0xff]  ;;  %s426_s1 = sshll.u32 %s545_s0, 4  ;;  %s427_s1 = int_to_ptr.vmem [resolvable:$true] %s426_s1 }
   0xe   :  { %v51_v6 = vld [vmem:[#allocation2 + $0x38] sm:$0xff]  ;;  %v46_v7 = vld [vmem:[#allocation2 + $0x10] sm:$0xff]  ;;  %v86_v8 = vadd.f32 %v45_v5, %v44_v4  ;;  %v56_v9 = vld [vmem:[#allocation2 + $0x60] sm:$0xff] }
   0xf   :  { %v223_v10 = vadd.f32 %v222_v3, %v50_v2  ;;  %v47_v11 = vld [vmem:[#allocation2 + $0x18] sm:$0xff]  ;;  %v57_v12 = vld [vmem:[#allocation2 + $0x68] sm:$0xff]  ;;  %v58_v14 = vld [vmem:[#allocation2 + $0x70] sm:$0xff] }
  0x10   :  { %v87_v13 = vadd.f32 %v86_v8, %v46_v7  ;;  %v227_v15 = vadd.f32 %v57_v12, %v56_v9  ;;  %v52_v16 = vld [vmem:[#allocation2 + $0x40] sm:$0xff]  ;;  %v53_v17 = vld [vmem:[#allocation2 + $0x48] sm:$0xff]  ;;  %v54_v19 = vld [vmem:[#allocation2 + $0x50] sm:$0xff] }
  0x11   :  { %v224_v18 = vadd.f32 %v223_v10, %v51_v6  ;;  %v91_v20 = vadd.f32 %v53_v17, %v52_v16  ;;  %v59_v23 = vld [vmem:[#allocation2 + $0x78] sm:$0xff] }
  0x12   :  { %v88_v21 = vadd.f32 %v87_v13, %v47_v11  ;;  %v228_v22 = vadd.f32 %v227_v15, %v58_v14  ;;  %v55_v25 = vld [vmem:[#allocation2 + $0x58] sm:$0xff] }
  0x13   :  { %225 = vadd.xlane.f32.xlu1 %v224_v18  ;;  %v92_v24 = vadd.f32 %v91_v20, %v54_v19 }
  0x14   :  { %89 = vadd.xlane.f32.xlu0 %v88_v21  ;;  %v229_v26 = vadd.f32 %v228_v22, %v59_v23 }
  0x15   :  { %v93_v27 = vadd.f32 %v92_v24, %v55_v25 }
  0x1b   :  { %230 = vadd.xlane.f32.xlu1 %v229_v26 }
  0x1c   :  { %94 = vadd.xlane.f32.xlu0 %v93_v27 }
  0x86   :  { %v226_v28 = vpop.xlane.xlu1 %225 }
  0x87   :  { %v232_v29 = vmul.f32 0.001953125, %v226_v28  ;;  %v90_v30 = vpop.xlane.xlu0 %89 }
  0x88   :  { %v96_v31 = vmul.f32 0.001953125, %v90_v30 }
  0x89   :  { %v573_v32 = vsub.f32 %v48_v0, %v232_v29  ;;  %v575_v33 = vsub.f32 %v49_v1, %v232_v29  ;;  %v577_v34 = vsub.f32 %v50_v2, %v232_v29  ;;  %v585_v38 = vsub.f32 %v51_v6, %v232_v29 }
  0x8a   :  { %v579_v35 = vsub.f32 %v44_v4, %v96_v31  ;;  %v581_v36 = vsub.f32 %v45_v5, %v96_v31  ;;  %v583_v37 = vsub.f32 %v46_v7, %v96_v31  ;;  %v591_v41 = vsub.f32 %v47_v11, %v96_v31 }
  0x8b   :  { %v242_v39 = vmul.f32 %v573_v32, %v573_v32  ;;  %v243_v40 = vmul.f32 %v575_v33, %v575_v33  ;;  %v244_v44 = vmul.f32 %v577_v34, %v577_v34  ;;  %v245_v51 = vmul.f32 %v585_v38, %v585_v38 }
  0x8c   :  { %v106_v42 = vmul.f32 %v579_v35, %v579_v35  ;;  %v107_v43 = vmul.f32 %v581_v36, %v581_v36  ;;  %v108_v47 = vmul.f32 %v583_v37, %v583_v37  ;;  %v109_v54 = vmul.f32 %v591_v41, %v591_v41 }
  0x8d   :  { %v250_v45 = vadd.f32 %v243_v40, %v242_v39 }
  0x8e   :  { %v231_v46 = vpop.xlane.xlu1 %230  ;;  %v114_v48 = vadd.f32 %v107_v43, %v106_v42 }
  0x8f   :  { %v233_v49 = vmul.f32 0.001953125, %v231_v46  ;;  %v95_v50 = vpop.xlane.xlu0 %94  ;;  %v251_v52 = vadd.f32 %v250_v45, %v244_v44 }
  0x90   :  { %v97_v53 = vmul.f32 0.001953125, %v95_v50  ;;  %v115_v55 = vadd.f32 %v114_v48, %v108_v47 }
  0x91   :  { %v605_v56 = vsub.f32 %v56_v9, %v233_v49  ;;  %v607_v57 = vsub.f32 %v57_v12, %v233_v49  ;;  %v252_v58 = vadd.f32 %v251_v52, %v245_v51  ;;  %v609_v59 = vsub.f32 %v58_v14, %v233_v49 }
  0x92   :  { %v611_v60 = vsub.f32 %v52_v16, %v97_v53  ;;  %v613_v61 = vsub.f32 %v53_v17, %v97_v53  ;;  %v116_v62 = vadd.f32 %v115_v55, %v109_v54  ;;  %v615_v63 = vsub.f32 %v59_v23, %v233_v49 }
  0x93   :  { %253 = vadd.xlane.f32.xlu0 %v252_v58  ;;  %v246_v0 = vmul.f32 %v605_v56, %v605_v56  ;;  %v247_v1 = vmul.f32 %v607_v57, %v607_v57  ;;  %v621_v2 = vsub.f32 %v54_v19, %v97_v53  ;;  %v623_v3 = vsub.f32 %v55_v25, %v97_v53 }
  0x94   :  { %117 = vadd.xlane.f32.xlu2 %v116_v62  ;;  %v110_v4 = vmul.f32 %v611_v60, %v611_v60  ;;  %v111_v5 = vmul.f32 %v613_v61, %v613_v61  ;;  %v248_v6 = vmul.f32 %v609_v59, %v609_v59  ;;  %v249_v10 = vmul.f32 %v615_v63, %v615_v63 }
  0x95   :  { %v255_v7 = vadd.f32 %v247_v1, %v246_v0  ;;  %v112_v8 = vmul.f32 %v621_v2, %v621_v2  ;;  %v113_v12 = vmul.f32 %v623_v3, %v623_v3 }
  0x96   :  { %v119_v9 = vadd.f32 %v111_v5, %v110_v4 }
  0x97   :  { %v256_v11 = vadd.f32 %v255_v7, %v248_v6 }
  0x98   :  { %v120_v13 = vadd.f32 %v119_v9, %v112_v8 }
  0x99   :  { %v257_v14 = vadd.f32 %v256_v11, %v249_v10 }
  0x9a   :  { %v121_v15 = vadd.f32 %v120_v13, %v113_v12 }
  0x9b   :  { %258 = vadd.xlane.f32.xlu1 %v257_v14 }
  0x9c   :  { %122 = vadd.xlane.f32.xlu2 %v121_v15 }
 0x106   :  { %v254_v16 = vpop.xlane.xlu0 %253 }
 0x107   :  { %v118_v17 = vpop.xlane.xlu2 %117  ;;  %v260_v18 = vmul.f32 0.0019569471, %v254_v16 }
 0x108   :  { %v124_v19 = vmul.f32 0.0019569471, %v118_v17 }
 0x109   :  { %447 = vrsqrt.f32 %v260_v18  ;;  %vm269_vm0 = vcmp.eq.f32.partialorder %v260_v18, inf  ;;  %vm271_vm1 = vcmp.eq.f32.partialorder %v260_v18, 0.0  ;;  %v272_v51 = vand.u32 2147483648, %v260_v18 }
 0x10a   :  { %449 = vrsqrt.f32 %v124_v19  ;;  %vm133_vm2 = vcmp.eq.f32.partialorder %v124_v19, inf  ;;  %v136_v53 = vand.u32 2147483648, %v124_v19  ;;  %vm135_vm3 = vcmp.eq.f32.partialorder %v124_v19, 0.0 }
 0x10e   :  { %v259_v20 = vpop.xlane.xlu1 %258 }
 0x10f   :  { %v448_v21 = vpop.eup %447  ;;  %v261_v22 = vmul.f32 0.0019569471, %v259_v20  ;;  %v123_v23 = vpop.xlane.xlu2 %122 }
 0x110   :  { %v450_v24 = vpop.eup %449  ;;  %v263_v25 = vmul.f32 %v448_v21, %v260_v18  ;;  %v125_v26 = vmul.f32 0.0019569471, %v123_v23 }
 0x111   :  { %v127_v27 = vmul.f32 %v450_v24, %v124_v19  ;;  %451 = vrsqrt.f32 %v261_v22  ;;  %vm281_vm4 = vcmp.eq.f32.partialorder %v261_v22, inf  ;;  %v284_v14 = vand.u32 2147483648, %v261_v22 }
 0x112   :  { %v264_v28 = vmul.f32 %v448_v21, %v263_v25  ;;  %453 = vrsqrt.f32 %v125_v26  ;;  %vm145_vm5 = vcmp.eq.f32.partialorder %v125_v26, inf  ;;  %vm283_vm6 = vcmp.eq.f32.partialorder %v261_v22, 0.0 }
 0x113   :  { %v128_v29 = vmul.f32 %v450_v24, %v127_v27  ;;  %vm147_vm7 = vcmp.eq.f32.partialorder %v125_v26, 0.0 }
 0x114   :  { %v265_v30 = vmul.f32 0.5, %v264_v28 }
 0x115   :  { %v129_v31 = vmul.f32 0.5, %v128_v29 }
 0x116   :  { %v266_v39 = vsub.f32 1.5, %v265_v30 }
 0x117   :  { %v452_v40 = vpop.eup %451  ;;  %v130_v42 = vsub.f32 1.5, %v129_v31 }
 0x118   :  { %v454_v43 = vpop.eup %453  ;;  %v267_v44 = vmul.f32 %v448_v21, %v266_v39  ;;  %v275_v45 = vmul.f32 %v452_v40, %v261_v22 }
 0x119   :  { %v131_v46 = vmul.f32 %v450_v24, %v130_v42  ;;  %v139_v47 = vmul.f32 %v454_v43, %v125_v26 }
 0x11a   :  { %v268_v48 = vmul.f32 %v267_v44, %v260_v18  ;;  %v276_v49 = vmul.f32 %v452_v40, %v275_v45  ;;  %v645_v44 = vld [vmem:[#allocation5] sm:$0xff]  ;;  %v647_v45 = vld [vmem:[#allocation5 + $0x8] sm:$0xff] }
 0x11b   :  { %v132_v50 = vmul.f32 %v131_v46, %v124_v19  ;;  %v140_v52 = vmul.f32 %v454_v43, %v139_v47  ;;  %v649_v46 = vld [vmem:[#allocation5 + $0x10] sm:$0xff]  ;;  %v651_v47 = vld [vmem:[#allocation5 + $0x18] sm:$0xff] }
 0x11c   :  { %v270_v54 = vsel %vm269_vm0, %v260_v18, %v268_v48  ;;  %v277_v55 = vmul.f32 0.5, %v276_v49  ;;  %v148_v18 = vand.u32 2147483648, %v125_v26  ;;  %v728_v48 = vld [vmem:[#allocation5 + $0xb8] sm:$0xff] }
 0x11d   :  { %v134_v58 = vsel %vm133_vm2, %v124_v19, %v132_v50  ;;  %v273_v62 = vsel %vm271_vm1, %v272_v51, %v270_v54  ;;  %v141_v0 = vmul.f32 0.5, %v140_v52  ;;  %v662_v52 = vld [vmem:[#allocation5 + $0x20] sm:$0xff]  ;;  %v666_v54 = vld [vmem:[#allocation5 + $0x30] sm:$0xff] }
 0x11e   :  { %v137_v1 = vsel %vm135_vm3, %v136_v53, %v134_v58  ;;  %v286_v4 = vadd.f32 1e-10, %v273_v62  ;;  %v278_v5 = vsub.f32 1.5, %v277_v55  ;;  %v664_v53 = vld [vmem:[#allocation5 + $0x28] sm:$0xff]  ;;  %v669_v58 = vld [vmem:[#allocation5 + $0x40] sm:$0xff] }
 0x11f   :  { %v150_v6 = vadd.f32 1e-10, %v137_v1  ;;  %v142_v7 = vsub.f32 1.5, %v141_v0  ;;  %v671_v62 = vld [vmem:[#allocation5 + $0x48] sm:$0xff]  ;;  %v673_v0 = vld [vmem:[#allocation5 + $0x50] sm:$0xff] }
 0x120   :  { %455 = vrcp.f32 %v286_v4  ;;  %v279_v8 = vmul.f32 %v452_v40, %v278_v5  ;;  %v297_v25 = vand.u32 2147483647, %v286_v4  ;;  %v299_v27 = vand.u32 2147483648, %v286_v4 }
 0x121   :  { %457 = vrcp.f32 %v150_v6  ;;  %v143_v9 = vmul.f32 %v454_v43, %v142_v7  ;;  %v163_v28 = vand.u32 2147483648, %v150_v6  ;;  %v161_v39 = vand.u32 2147483647, %v150_v6 }
 0x122   :  { %v280_v10 = vmul.f32 %v279_v8, %v261_v22  ;;  %vm293_vm10 = vweird.f32 %v286_v4  ;;  %vm157_vm11 = vweird.f32 %v150_v6  ;;  %v300_v43 = vor.u32 1.1754944e-38, %v299_v27 }
 0x123   :  { %v144_v11 = vmul.f32 %v143_v9, %v125_v26  ;;  %v164_v49 = vor.u32 1.1754944e-38, %v163_v28  ;;  %vm298_vm14 = vcmp.eq.f32.partialorder %v297_v25, 8.507059e+37  ;;  %vm162_vm15 = vcmp.eq.f32.partialorder %v161_v39, 8.507059e+37  ;;  %v716_v25 = vld [vmem:[#allocation5 + $0x98] sm:$0xff] }
 0x124   :  { %v282_v13 = vsel %vm281_vm4, %v261_v22, %v280_v10  ;;  %821 = vst [vmem:[#allocation14_spill] sm:$0xff] %v716_v25 }
 0x125   :  { %v146_v15 = vsel %vm145_vm5, %v125_v26, %v144_v11  ;;  %v285_v20 = vsel %vm283_vm6, %v284_v14, %v282_v13  ;;  %v686_v13 = vld [vmem:[#allocation5 + $0x68] sm:$0xff]  ;;  %v688_v14 = vld [vmem:[#allocation5 + $0x70] sm:$0xff] }
 0x126   :  { %v456_v12 = vpop.eup %455  ;;  %v149_v23 = vsel %vm147_vm7, %v148_v18, %v146_v15  ;;  %v637_v30 = vadd.f32 1e-10, %v285_v20  ;;  %v690_v15 = vld [vmem:[#allocation5 + $0x58] sm:$0xff]  ;;  %v706_v20 = vld [vmem:[#allocation5 + $0xa8] sm:$0xff] }
 0x127   :  { %v458_v16 = vpop.eup %457  ;;  %v289_v17 = vmul.f32 %v456_v12, %v286_v4  ;;  %vm294_vm8 = vweird.f32 %v456_v12  ;;  %v639_v40 = vadd.f32 1e-10, %v149_v23  ;;  %v675_v4 = vld [vmem:[#allocation5 + $0x38] sm:$0xff]  ;;  %v712_v23 = vld [vmem:[#allocation5 + $0x88] sm:$0xff] }
 0x128   :  { %v153_v19 = vmul.f32 %v458_v16, %v150_v6  ;;  %vm158_vm9 = vweird.f32 %v458_v16  ;;  %vm641_vm12 = vmor %vm293_vm10, %vm294_vm8  ;;  %459 = vrcp.f32 %v637_v30  ;;  %819 = vst [vmem:[#allocation12_spill] sm:$0xff] %v712_v23  ;;  %vm308_vm10 = vweird.f32 %v637_v30 }
 0x129   :  { %v290_v21 = vsub.f32 1.0, %v289_v17  ;;  %vm653_vm13 = vmor %vm157_vm11, %vm158_vm9  ;;  %461 = vrcp.f32 %v639_v40 }
 0x12a   :  { %v154_v24 = vsub.f32 1.0, %v153_v19  ;;  %v704_v19 = vld [vmem:[#allocation5 + $0xa0] sm:$0xff] }
 0x12b   :  { %v291_v29 = vmul.f32 %v456_v12, %v290_v21  ;;  %v708_v21 = vld [vmem:[#allocation5 + $0xb0] sm:$0xff] }
 0x12c   :  { %v155_v31 = vmul.f32 %v458_v16, %v154_v24  ;;  %v714_v24 = vld [vmem:[#allocation5 + $0x90] sm:$0xff] }
 0x12d   :  { %v292_v22 = vadd.f32 %v456_v12, %v291_v29  ;;  %820 = vst [vmem:[#allocation13_spill] sm:$0xff] %v714_v24 }
 0x12e   :  { %v156_v42 = vadd.f32 %v458_v16, %v155_v31 }
 0x12f   :  { %v296_v50 = vsel %vm641_vm12, %v456_v12, %v292_v22  ;;  %v684_v12 = vld [vmem:[#allocation5 + $0x60] sm:$0xff]  ;;  %vm172_vm12 = vweird.f32 %v639_v40 }
 0x130   :  { %v160_v51 = vsel %vm653_vm13, %v458_v16, %v156_v42  ;;  %v301_v55 = vsel %vm298_vm14, %v300_v43, %v296_v50 }
 0x131   :  { %v165_v1 = vsel %vm162_vm15, %v164_v49, %v160_v51  ;;  %v318_v5 = vmul.f32 %v301_v55, %v573_v32  ;;  %v319_v6 = vmul.f32 %v301_v55, %v575_v33  ;;  %v320_v7 = vmul.f32 %v301_v55, %v577_v34  ;;  %v692_v32 = vld [vmem:[#allocation5 + $0x80] sm:$0xff]  ;;  %v694_v33 = vld [vmem:[#allocation5 + $0x78] sm:$0xff] }
 0x132   :  { %v182_v8 = vmul.f32 %v165_v1, %v579_v35  ;;  %v183_v9 = vmul.f32 %v165_v1, %v581_v36  ;;  %v184_v10 = vmul.f32 %v165_v1, %v583_v37  ;;  %v185_v11 = vmul.f32 %v165_v1, %v591_v41  ;;  %818 = vst [vmem:[#allocation11_spill] sm:$0xff] %v692_v32 }
 0x133   :  { %v321_v34 = vmul.f32 %v301_v55, %v585_v38  ;;  %v326_v35 = vmul.f32 %v318_v5, %v662_v52  ;;  %v327_v36 = vmul.f32 %v319_v6, %v664_v53  ;;  %v328_v37 = vmul.f32 %v320_v7, %v666_v54  ;;  %v710_v38 = vpop.eup %459 }
 0x134   :  { %v190_v41 = vmul.f32 %v182_v8, %v645_v44  ;;  %v191_v16 = vmul.f32 %v183_v9, %v647_v45  ;;  %v192_v17 = vmul.f32 %v184_v10, %v649_v46  ;;  %v193_v18 = vmul.f32 %v185_v11, %v651_v47  ;;  %v722_v39 = vpop.eup %461 }
 0x135   :  { %v329_v27 = vmul.f32 %v321_v34, %v675_v4  ;;  %v334_v28 = vadd.f32 %v326_v35, %v684_v12  ;;  %v335_v29 = vadd.f32 %v327_v36, %v686_v13  ;;  %v336_v31 = vadd.f32 %v328_v37, %v688_v14 }
 0x136   :  { %v198_v22 = vadd.f32 %v190_v41, %v669_v58  ;;  %v199_v42 = vadd.f32 %v191_v16, %v671_v62  ;;  %v200_v26 = vadd.f32 %v192_v17, %v673_v0  ;;  %v201_v43 = vadd.f32 %v193_v18, %v690_v15 }
 0x137   :  { %v337_v49 = vadd.f32 %v329_v27, %v694_v33  ;;  %v342_v50 = vmul.f32 %v334_v28, %v704_v19  ;;  %v343_v51 = vmul.f32 %v335_v29, %v706_v20  ;;  %v344_v55 = vmul.f32 %v336_v31, %v708_v21 }
 0x138   :  { %v206_v1 = vmul.f32 %v198_v22, %v692_v32  ;;  %v207_v5 = vmul.f32 %v199_v42, %v712_v23  ;;  %v208_v6 = vmul.f32 %v200_v26, %v714_v24  ;;  %v209_v7 = vmul.f32 %v201_v43, %v716_v25 }
 0x139   :  { %v345_v8 = vmul.f32 %v337_v49, %v728_v48  ;;  %vm350_vm0 = vcmp.ge.f32.partialorder %v342_v50, 0.0  ;;  %vm351_vm1 = vcmp.ge.f32.partialorder %v343_v51, 0.0  ;;  %vm352_vm2 = vcmp.ge.f32.partialorder %v344_v55, 0.0 }
 0x13a   :  { %vm214_vm3 = vcmp.ge.f32.partialorder %v206_v1, 0.0  ;;  %vm215_vm4 = vcmp.ge.f32.partialorder %v207_v5, 0.0  ;;  %vm216_vm5 = vcmp.ge.f32.partialorder %v208_v6, 0.0  ;;  %vm217_vm6 = vcmp.ge.f32.partialorder %v209_v7, 0.0 }
 0x13b   :  { %v358_v9 = vsel %vm214_vm3, %v198_v22, 0.0  ;;  %v359_v10 = vsel %vm215_vm4, %v199_v42, 0.0  ;;  %v360_v11 = vsel %vm216_vm5, %v200_v26, 0.0  ;;  %v361_v34 = vsel %vm217_vm6, %v201_v43, 0.0 }
 0x13c   :  { %v398_v35 = vsel %vm214_vm3, 0.0, %v198_v22  ;;  %v399_v36 = vsel %vm215_vm4, 0.0, %v199_v42  ;;  %v400_v37 = vsel %vm216_vm5, 0.0, %v200_v26  ;;  %vm353_vm7 = vcmp.ge.f32.partialorder %v345_v8, 0.0 }
 0x13d   :  { %v366_v41 = vsel %vm350_vm0, 0.0, %v334_v28  ;;  %v367_v16 = vsel %vm351_vm1, 0.0, %v335_v29  ;;  %v368_v17 = vsel %vm352_vm2, 0.0, %v336_v31  ;;  %v369_v18 = vsel %vm353_vm7, 0.0, %v337_v49 }
 0x13e   :  { %v374_v27 = vadd.f32 %v366_v41, %v358_v9  ;;  %v375_v1 = vadd.f32 %v367_v16, %v359_v10  ;;  %v376_v5 = vadd.f32 %v368_v17, %v360_v11  ;;  %v377_v6 = vadd.f32 %v369_v18, %v361_v34 }
 0x13f   :  { %v390_v25 = vsel %vm350_vm0, %v334_v28, 0.0  ;;  %v391_v24 = vsel %vm351_vm1, %v335_v29, 0.0  ;;  %v392_v22 = vsel %vm352_vm2, %v336_v31, 0.0  ;;  %v401_v42 = vsel %vm217_vm6, 0.0, %v201_v43 }
 0x140   :  { %382 = vst [vmem:[#allocation7] sm:$0xff] %v374_v27  ;;  %v393_v26 = vsel %vm353_vm7, %v337_v49, 0.0  ;;  %v406_v8 = vadd.f32 %v398_v35, %v390_v25  ;;  %v407_v23 = vadd.f32 %v399_v36, %v391_v24  ;;  %v304_v32 = vmul.f32 %v710_v38, %v637_v30 }
 0x141   :  { %383 = vst [vmem:[#allocation7 + $0x8] sm:$0xff] %v375_v1  ;;  %v168_v9 = vmul.f32 %v722_v39, %v639_v40  ;;  %v408_v50 = vadd.f32 %v400_v37, %v392_v22  ;;  %v409_v28 = vadd.f32 %v401_v42, %v393_v26  ;;  %vm309_vm8 = vweird.f32 %v710_v38  ;;  %v822_v1 = vld [vmem:[#allocation11_spill] sm:$0xff]  ;;  %v825_v22 = vld [vmem:[#allocation14_spill] sm:$0xff] }
 0x142   :  { %384 = vst [vmem:[#allocation7 + $0x10] sm:$0xff] %v376_v5  ;;  %v305_v29 = vsub.f32 1.0, %v304_v32  ;;  %v312_v31 = vand.u32 2147483647, %v637_v30  ;;  %v314_v25 = vand.u32 2147483648, %v637_v30  ;;  %v178_v24 = vand.u32 2147483648, %v639_v40  ;;  %vm310_vm11 = vmor %vm308_vm10, %vm309_vm8 }
 0x143   :  { %385 = vst [vmem:[#allocation7 + $0x18] sm:$0xff] %v377_v6  ;;  %v169_v51 = vsub.f32 1.0, %v168_v9  ;;  %vm173_vm9 = vweird.f32 %v722_v39  ;;  %v176_v55 = vand.u32 2147483647, %v639_v40  ;;  %v823_v5 = vld [vmem:[#allocation12_spill] sm:$0xff]  ;;  %v824_v6 = vld [vmem:[#allocation13_spill] sm:$0xff] }
 0x144   :  { %414 = vst [vmem:[#allocation7 + $0x20] sm:$0xff] %v406_v8  ;;  %v306_v43 = vmul.f32 %v710_v38, %v305_v29  ;;  %vm174_vm13 = vmor %vm172_vm12, %vm173_vm9  ;;  %v179_v10 = vor.u32 1.1754944e-38, %v178_v24  ;;  %vm313_vm14 = vcmp.eq.f32.partialorder %v312_v31, 8.507059e+37 }
 0x145   :  { %415 = vst [vmem:[#allocation7 + $0x28] sm:$0xff] %v407_v23  ;;  %v170_v49 = vmul.f32 %v722_v39, %v169_v51  ;;  %v315_v23 = vor.u32 1.1754944e-38, %v314_v25  ;;  %vm177_vm15 = vcmp.eq.f32.partialorder %v176_v55, 8.507059e+37 }
 0x146   :  { %416 = vst [vmem:[#allocation7 + $0x30] sm:$0xff] %v408_v50  ;;  %v307_v32 = vadd.f32 %v710_v38, %v306_v43 }
 0x147   :  { %417 = vst [vmem:[#allocation7 + $0x38] sm:$0xff] %v409_v28  ;;  %v171_v7 = vadd.f32 %v722_v39, %v170_v49 }
 0x148   :  { %v311_v11 = vsel %vm310_vm11, %v710_v38, %v307_v32 }
 0x149   :  { %v175_v34 = vsel %vm174_vm13, %v722_v39, %v171_v7  ;;  %v316_v35 = vsel %vm313_vm14, %v315_v23, %v311_v11 }
 0x14a   :  { %v180_v36 = vsel %vm177_vm15, %v179_v10, %v175_v34  ;;  %v322_v30 = vmul.f32 %v316_v35, %v605_v56  ;;  %v323_v37 = vmul.f32 %v316_v35, %v607_v57  ;;  %v324_v41 = vmul.f32 %v316_v35, %v609_v59 }
 0x14b   :  { %v325_v16 = vmul.f32 %v316_v35, %v615_v63  ;;  %v186_v40 = vmul.f32 %v180_v36, %v611_v60  ;;  %v187_v17 = vmul.f32 %v180_v36, %v613_v61  ;;  %v188_v38 = vmul.f32 %v180_v36, %v621_v2 }
 0x14c   :  { %v189_v18 = vmul.f32 %v180_v36, %v623_v3  ;;  %v330_v39 = vmul.f32 %v322_v30, %v662_v52  ;;  %v331_v27 = vmul.f32 %v323_v37, %v664_v53  ;;  %v332_v56 = vmul.f32 %v324_v41, %v666_v54 }
 0x14d   :  { %v333_v57 = vmul.f32 %v325_v16, %v675_v4  ;;  %v194_v59 = vmul.f32 %v186_v40, %v645_v44  ;;  %v195_v63 = vmul.f32 %v187_v17, %v647_v45  ;;  %v196_v60 = vmul.f32 %v188_v38, %v649_v46 }
 0x14e   :  { %v197_v61 = vmul.f32 %v189_v18, %v651_v47  ;;  %v338_v2 = vadd.f32 %v330_v39, %v684_v12  ;;  %v339_v3 = vadd.f32 %v331_v27, %v686_v13  ;;  %v340_v52 = vadd.f32 %v332_v56, %v688_v14 }
 0x14f   :  { %v341_v53 = vadd.f32 %v333_v57, %v694_v33  ;;  %v202_v54 = vadd.f32 %v194_v59, %v669_v58  ;;  %v203_v4 = vadd.f32 %v195_v63, %v671_v62  ;;  %v204_v44 = vadd.f32 %v196_v60, %v673_v0 }
 0x150   :  { %v205_v45 = vadd.f32 %v197_v61, %v690_v15  ;;  %v346_v46 = vmul.f32 %v338_v2, %v704_v19  ;;  %v347_v47 = vmul.f32 %v339_v3, %v706_v20  ;;  %v348_v12 = vmul.f32 %v340_v52, %v708_v21 }
 0x151   :  { %v349_v13 = vmul.f32 %v341_v53, %v728_v48  ;;  %v210_v14 = vmul.f32 %v202_v54, %v822_v1  ;;  %v211_v33 = vmul.f32 %v203_v4, %v823_v5  ;;  %v212_v58 = vmul.f32 %v204_v44, %v824_v6 }
 0x152   :  { %v213_v62 = vmul.f32 %v205_v45, %v825_v22  ;;  %vm354_vm0 = vcmp.ge.f32.partialorder %v346_v46, 0.0  ;;  %vm355_vm1 = vcmp.ge.f32.partialorder %v347_v47, 0.0  ;;  %vm356_vm2 = vcmp.ge.f32.partialorder %v348_v12, 0.0 }
 0x153   :  { %vm357_vm3 = vcmp.ge.f32.partialorder %v349_v13, 0.0  ;;  %v370_v0 = vsel %vm354_vm0, 0.0, %v338_v2  ;;  %v371_v15 = vsel %vm355_vm1, 0.0, %v339_v3  ;;  %v372_v19 = vsel %vm356_vm2, 0.0, %v340_v52 }
 0x154   :  { %v373_v20 = vsel %vm357_vm3, 0.0, %v341_v53  ;;  %v394_v21 = vsel %vm354_vm0, %v338_v2, 0.0  ;;  %v395_v48 = vsel %vm355_vm1, %v339_v3, 0.0  ;;  %vm218_vm4 = vcmp.ge.f32.partialorder %v210_v14, 0.0 }
 0x155   :  { %vm219_vm5 = vcmp.ge.f32.partialorder %v211_v33, 0.0  ;;  %vm220_vm6 = vcmp.ge.f32.partialorder %v212_v58, 0.0  ;;  %vm221_vm7 = vcmp.ge.f32.partialorder %v213_v62, 0.0  ;;  %v362_v42 = vsel %vm218_vm4, %v202_v54, 0.0 }
 0x156   :  { %v363_v26 = vsel %vm219_vm5, %v203_v4, 0.0  ;;  %v364_v8 = vsel %vm220_vm6, %v204_v44, 0.0  ;;  %v365_v9 = vsel %vm221_vm7, %v205_v45, 0.0  ;;  %v396_v50 = vsel %vm356_vm2, %v340_v52, 0.0 }
 0x157   :  { %v378_v28 = vadd.f32 %v370_v0, %v362_v42  ;;  %v379_v29 = vadd.f32 %v371_v15, %v363_v26  ;;  %v380_v51 = vadd.f32 %v372_v19, %v364_v8  ;;  %v381_v31 = vadd.f32 %v373_v20, %v365_v9 }
 0x158   :  { %v402_v25 = vsel %vm218_vm4, 0.0, %v202_v54  ;;  %v403_v24 = vsel %vm219_vm5, 0.0, %v203_v4  ;;  %v404_v43 = vsel %vm220_vm6, 0.0, %v204_v44  ;;  %v397_v49 = vsel %vm357_vm3, %v341_v53, 0.0 }
 0x159   :  { %386 = vst [vmem:[#allocation7 + $0x40] sm:$0xff] %v378_v28  ;;  %v405_v55 = vsel %vm221_vm7, 0.0, %v205_v45  ;;  %v410_v32 = vadd.f32 %v402_v25, %v394_v21  ;;  %v411_v7 = vadd.f32 %v403_v24, %v395_v48  ;;  %v412_v23 = vadd.f32 %v404_v43, %v396_v50 }
 0x15a   :  { %387 = vst [vmem:[#allocation7 + $0x48] sm:$0xff] %v379_v29  ;;  %v413_v10 = vadd.f32 %v405_v55, %v397_v49 }
 0x15b   :  { %388 = vst [vmem:[#allocation7 + $0x50] sm:$0xff] %v380_v51 }
 0x15c   :  { %389 = vst [vmem:[#allocation7 + $0x58] sm:$0xff] %v381_v31 }
 0x15d   :  { %418 = vst [vmem:[#allocation7 + $0x60] sm:$0xff] %v410_v32 }
 0x15e   :  { %419 = vst [vmem:[#allocation7 + $0x68] sm:$0xff] %v411_v7 }
 0x15f   :  { %420 = vst [vmem:[#allocation7 + $0x70] sm:$0xff] %v412_v23 }
 0x160   :  { %421 = vst [vmem:[#allocation7 + $0x78] sm:$0xff] %v413_v10 }
 0x161   :  { %434 = dma.vmem_to_hbm [thread:$0]  %s427_s1, 2048, %s429_s23, [#allocation4], %s542_s17, %s542_s17, %s543_s18  }
 0x162   :  { %539 = dma.done.wait [#allocation4], 2048  }
 0x163   :  { %540 = vsyncadd [#allocation4], 4294965248 }
 0x164   :  { %439 = vsyncpa [#allocation3], 1 }
 0x165   :  { %440 = vsyncpa [#allocation6], 1 }
 0x166   :  { %441 = vsyncpa [#allocation4], 1 }

</bundles_post_ra>
